<compile_context>
chip_gen: v7x
topology: tpu7x:2x2x1
jax: 0.10.0
libtpu: 0.0.40
codegen_flags: <defaults>
</compile_context>

<pallas_src>
import functools
import math

import jax
import jax.numpy as jnp
from jax.experimental import pallas as pl
from jax.experimental.pallas import tpu as pltpu

_LANE = 128
_COL_CANDIDATES = (512, 256, 128)   # lane-dense slab widths (multiples of 128)
_SMALL_N = 4096                     # below ~1 tile: plain jnp beats a kernel launch
_PER_BUFFER_BYTES = 2 << 20         # ~2 MiB per pipeline buffer (3 arrays x 2 bufs ~ 12 MiB)


def _round_up(x: int, m: int) -> int:
    return (x + m - 1) // m * m


def _sublane_pack(*dtypes) -> int:
    """Rows-per-vreg-sublane packing: f32 -> 8, bf16 -> 16, int8/fp8 -> 32."""
    min_itemsize = min(max(1, jnp.dtype(d).itemsize) for d in dtypes)
    return 8 * (4 // min_itemsize)


@functools.lru_cache(maxsize=None)
def _tensorcores_per_chip() -> int:
    """2 on megacore / dual-TC parts (v4, v5p, v7x); 1 on v5e/v6e."""
    try:
        kind = jax.devices()[0].device_kind.lower()
    except Exception:   # pragma: no cover - be conservative off-TPU
        return 1
    return 2 if any(tag in kind for tag in ("v4", "v5p", "v7", "7x")) else 1


def _elem_exp_loss_kernel(p_ref, t_ref, o_ref, *, f0: float):
    # abs(log2((p + f0) / (t + f0))); cast to f32 inside the kernel so bf16
    # callers don't pay a wrapper-side upcast (halves HBM read traffic).
    num = p_ref[...].astype(jnp.float32) + f0
    den = t_ref[...].astype(jnp.float32) + f0
    o_ref[...] = jnp.abs(jnp.log2(num / den)).astype(o_ref.dtype)


def _launch(p2: jax.Array, t2: jax.Array, f0: float, out_dtype, rows: int, cols: int):
    """pallas_call over a lane-dense (rows, cols) slab; uneven grid allowed."""
    out_dtype = jnp.dtype(out_dtype)
    pack = _sublane_pack(p2.dtype, t2.dtype, out_dtype)
    max_itemsize = max(p2.dtype.itemsize, t2.dtype.itemsize, out_dtype.itemsize)

    # Largest tile whose biggest buffer stays under ~2 MiB.
    max_tile_r = max(pack, (_PER_BUFFER_BYTES // (cols * max_itemsize)) // pack * pack)
    steps = pl.cdiv(rows, max_tile_r)

    # Only force extra steps on 2-TC parts (megacore), targeting an even count.
    if _tensorcores_per_chip() > 1 and rows >= 2 * pack:
        target = min(8, rows // pack)
        target = max(2, target - (target % 2))
        steps = max(steps, target)
        steps += steps % 2

    # Balanced split: padding inside the last block is < pack rows.
    tile_r = max(pack, _round_up(pl.cdiv(rows, steps), pack))
    grid_steps = pl.cdiv(rows, tile_r)
    if grid_steps == 1:
        tile_r = rows          # full-extent block: always legal, no masking needed
        grid_steps = 1

    # Exact double-buffered VMEM footprint + slack (well under v7x's 64 MiB).
    step_bytes = tile_r * cols * (p2.dtype.itemsize + t2.dtype.itemsize + out_dtype.itemsize)
    vmem_limit = int(min(48 << 20, 2 * step_bytes + (4 << 20)))

    n_elems = rows * cols
    cost = pl.CostEstimate(
        flops=4 * n_elems,
        transcendentals=2 * n_elems,   # log2 + reciprocal (divide)
        bytes_accessed=(p2.dtype.itemsize + t2.dtype.itemsize + out_dtype.itemsize) * n_elems,
    )

    return pl.pallas_call(
        functools.partial(_elem_exp_loss_kernel, f0=float(f0)),
        out_shape=jax.ShapeDtypeStruct((rows, cols), out_dtype),
        grid_spec=pl.GridSpec(
            grid=(grid_steps,),
            in_specs=[
                pl.BlockSpec((tile_r, cols), lambda i: (i, 0)),
                pl.BlockSpec((tile_r, cols), lambda i: (i, 0)),
            ],
            out_specs=pl.BlockSpec((tile_r, cols), lambda i: (i, 0)),
        ),
        compiler_params=pltpu.CompilerParams(
            dimension_semantics=("parallel",),
            vmem_limit_bytes=vmem_limit,
        ),
        cost_estimate=cost,
    )(p2, t2)


@functools.partial(jax.jit, static_argnames=("f0", "out_dtype"))
def elem_exp_loss(product: jax.Array, target: jax.Array, *, f0: float,
                  out_dtype=jnp.float32) -> jax.Array:
    """Elementwise ElemExpLoss over arrays of arbitrary (matching) shape."""
    product = jnp.asarray(product)
    target = jnp.asarray(target)
    assert product.shape == target.shape, "product/target shape mismatch"
    orig_shape = product.shape
    n = product.size
    out_dtype = jnp.dtype(out_dtype)

    def _jnp_path(p, t):
        num = p.astype(jnp.float32) + f0
        den = t.astype(jnp.float32) + f0
        return jnp.abs(jnp.log2(num / den)).astype(out_dtype)

    # Tiny inputs: a fused XLA elementwise op beats kernel-launch overhead.
    if n == 0 or n < _SMALL_N:
        return _jnp_path(product, target).reshape(orig_shape)

    p_flat = product.reshape(-1)
    t_flat = target.reshape(-1)

    # Pick the widest lane-dense slab width that divides n exactly (zero-copy
    # path); otherwise fall back to 512 and handle the < 512-elem tail in jnp.
    cols = next((c for c in _COL_CANDIDATES if n % c == 0), _COL_CANDIDATES[0])
    rows = n // cols
    n_bulk = rows * cols

    if n_bulk == n:
        out = _launch(p_flat.reshape(rows, cols), t_flat.reshape(rows, cols),
                      f0, out_dtype, rows, cols)
        return out.reshape(orig_shape)

    # Unaligned: aligned bulk through the kernel, tiny tail with plain jnp.
    # (No jnp.pad of the inputs, no [:n] slice of a padded output.)
    bulk = _launch(p_flat[:n_bulk].reshape(rows, cols),
                   t_flat[:n_bulk].reshape(rows, cols),
                   f0, out_dtype, rows, cols)
    tail = _jnp_path(p_flat[n_bulk:], t_flat[n_bulk:])
    return jnp.concatenate([bulk.reshape(-1), tail]).reshape(orig_shape)


def elem_exp_loss_scalar(product: float, target: float, f0: float) -> float:
    """Exact PyTorch forward semantics (scalars don't warrant a kernel launch)."""
    return abs(math.log2((product + f0) / (target + f0)))


if __name__ == "__main__":
    # Deterministic "config": cfg.base_freq
    f0 = 0.5

    key = jax.random.PRNGKey(0)
    kp, kt, kp2, kt2, kp3, kt3 = jax.random.split(key, 6)

    # 1) lane-aligned f32: zero-copy path (no pad, no output slice) -----------
    R, C = 16, 512
    product = jax.random.uniform(kp, (R, C), jnp.float32, minval=0.0, maxval=2.0)
    target = jax.random.uniform(kt, (R, C), jnp.float32, minval=0.0, maxval=2.0)
    out = jax.block_until_ready(elem_exp_loss(product, target, f0=f0))
    ref = jnp.abs(jnp.log2((product + f0) / (target + f0)))
    assert out.shape == (R, C) and out.dtype == jnp.float32
    assert jnp.allclose(out, ref, rtol=1e-5, atol=1e-5)

    # 2) unaligned shape: kernel bulk + tiny jnp tail, uneven last block ------
    p2 = jax.random.uniform(kp2, (33, 217), jnp.float32, minval=0.0, maxval=2.0)
    t2 = jax.random.uniform(kt2, (33, 217), jnp.float32, minval=0.0, maxval=2.0)
    out2 = jax.block_until_ready(elem_exp_loss(p2, t2, f0=f0))
    ref2 = jnp.abs(jnp.log2((p2 + f0) / (t2 + f0)))
    assert out2.shape == p2.shape
    assert not jnp.any(jnp.isnan(out2))
    assert jnp.allclose(out2, ref2, rtol=1e-5, atol=1e-5)

    # 3) bf16 inputs with bf16 output: cast inside kernel, ~6 B/elem traffic --
    p3 = jax.random.uniform(kp3, (32, 512), jnp.float32, minval=0.0, maxval=2.0).astype(jnp.bfloat16)
    t3 = jax.random.uniform(kt3, (32, 512), jnp.float32, minval=0.0, maxval=2.0).astype(jnp.bfloat16)
    out3 = jax.block_until_ready(elem_exp_loss(p3, t3, f0=f0, out_dtype=jnp.bfloat16))
    ref3 = jnp.abs(jnp.log2((p3.astype(jnp.float32) + f0) / (t3.astype(jnp.float32) + f0)))
    assert out3.dtype == jnp.bfloat16
    assert jnp.allclose(out3.astype(jnp.float32), ref3, rtol=2e-2, atol=2e-2)

    # 4) tiny input: plain-jnp fast path (no kernel launch) -------------------
    p4 = jax.random.uniform(kp, (7, 50), jnp.float32, minval=0.0, maxval=2.0)
    t4 = jax.random.uniform(kt, (7, 50), jnp.float32, minval=0.0, maxval=2.0)
    out4 = jax.block_until_ready(elem_exp_loss(p4, t4, f0=f0))
    ref4 = jnp.abs(jnp.log2((p4 + f0) / (t4 + f0)))
    assert jnp.allclose(out4, ref4, rtol=1e-5, atol=1e-5)

    # 5) exact scalar semantics of the PyTorch module (no Pallas launch) ------
    p_s, t_s = 0.37, 0.81
    scalar_out = elem_exp_loss_scalar(p_s, t_s, f0)
    scalar_ref = abs(math.log2((p_s + f0) / (t_s + f0)))
    assert abs(scalar_out - scalar_ref) < 1e-12

    print("KERNEL_OK")
</pallas_src>

<mosaic_0001>
module attributes {stable_mosaic.version = 11 : i64} {
  func.func @_elem_exp_loss_kernel(%arg0: i32, %arg1: memref<16x512xf32, #tpu.memory_space<vmem>>, %arg2: memref<16x512xf32, #tpu.memory_space<vmem>>, %arg3: memref<16x512xf32, #tpu.memory_space<vmem>>) attributes {dimension_semantics = [#tpu.dimension_semantics<parallel>], iteration_bounds = array<i64: 1>, scalar_prefetch = 0 : i64, scratch_operands = 0 : i64, tpu.core_type = #tpu.core_type<tc>, window_params = [{transform_indices = @transform_0, window_bounds = array<i64: 16, 512>}, {transform_indices = @transform_1, window_bounds = array<i64: 16, 512>}, {transform_indices = @transform_2, window_bounds = array<i64: 16, 512>}]} {
    %c0 = arith.constant 0 : index
    %c0_0 = arith.constant 0 : index
    %0 = vector.load %arg1[%c0, %c0_0] : memref<16x512xf32, #tpu.memory_space<vmem>>, vector<16x512xf32>
    %cst = arith.constant 5.000000e-01 : f32
    %1 = vector.broadcast %cst : f32 to vector<16x512xf32>
    %2 = arith.addf %0, %1 : vector<16x512xf32>
    %c0_1 = arith.constant 0 : index
    %c0_2 = arith.constant 0 : index
    %3 = vector.load %arg2[%c0_1, %c0_2] : memref<16x512xf32, #tpu.memory_space<vmem>>, vector<16x512xf32>
    %cst_3 = arith.constant 5.000000e-01 : f32
    %4 = vector.broadcast %cst_3 : f32 to vector<16x512xf32>
    %5 = arith.addf %3, %4 : vector<16x512xf32>
    %6 = arith.divf %2, %5 : vector<16x512xf32>
    %7 = math.log %6 : vector<16x512xf32>
    %cst_4 = arith.constant 2.000000e+00 : f32
    %8 = math.log %cst_4 : f32
    %9 = vector.broadcast %8 : f32 to vector<16x512xf32>
    %10 = arith.divf %7, %9 : vector<16x512xf32>
    %11 = math.absf %10 : vector<16x512xf32>
    %c0_5 = arith.constant 0 : index
    %c0_6 = arith.constant 0 : index
    %12 = vector.load %arg3[%c0_5, %c0_6] : memref<16x512xf32, #tpu.memory_space<vmem>>, vector<16x512xf32>
    tpu.vector_store %arg3[%c0_5, %c0_6], %11 {strides = array<i32>} : memref<16x512xf32, #tpu.memory_space<vmem>>, vector<16x512xf32>,
    return
  }
  func.func @transform_0(%arg0: i32) -> (i32, i32) {
    %c0_i32 = arith.constant 0 : i32
    %c0_i32_0 = arith.constant 0 : i32
    return %arg0, %c0_i32 : i32, i32
  }
  func.func @transform_1(%arg0: i32) -> (i32, i32) {
    %c0_i32 = arith.constant 0 : i32
    %c0_i32_0 = arith.constant 0 : i32
    return %arg0, %c0_i32 : i32, i32
  }
  func.func @transform_2(%arg0: i32) -> (i32, i32) {
    %c0_i32 = arith.constant 0 : i32
    %c0_i32_0 = arith.constant 0 : i32
    return %arg0, %c0_i32 : i32, i32
  }
}

</mosaic_0001>

<bundles_post_ra>
// kernel: elem_exp_loss.1
= control target key start
LH: loop header
LB: loop body
LE: loop exit
PB: predicated region body
PF: predicated region fallthrough
CT: control target
= control target key end

     0   :  { %7 = vsyncpa [#allocation3], 0  ;;  %s321_s0 = inlined_call_operand.hbm [shape: f32[16,512], index: 0, kind: input, shape index: {}]   ;;  %s322_s1 = inlined_call_operand.hbm [shape: f32[16,512], index: 1, kind: input, shape index: {}]   ;;  %s323_s2 = inlined_call_operand.hbm [shape: f32[16,512], index: 2, kind: output, shape index: {}]  }
   0x1   :  { %8 = vsyncpa [#allocation6], 0 }
   0x2   :  { %9 = vsyncpa [#allocation4], 0  ;;  %s256_s9 = smov [#allocation2]   ;;  %s184_s13 = scalar_lea.hbm %s321_s0, 1024 }
   0x3   :  { %s15_s10 = sshll.u32 %s256_s9, 4  ;;  %p185_p0 = scmp.ne.s32.totalorder %s321_s0, %s184_s13  ;;  %s16_s10 = int_to_ptr.vmem [resolvable:$true] %s15_s10 }
   0x4   :  { %p188_p1 = scmp.lt.u32.totalorder %s184_s13, %s321_s0 }
   0x6   :  { %p190_p2 = pnand %p188_p1, %p185_p0 }
   0x8   :  { %193 = shalt.err (!%p190_p2)
}
   0x9   :  { %s194_s18 = scalar_lea.vmem %s16_s10, 1024  ;;  %p199_p4 = scmp.lt.s32.totalorder %s16_s10, %s16_s10 }
   0xa   :  { %p195_p3 = scmp.ne.s32.totalorder %s16_s10, %s194_s18  ;;  %p200_p5 = scmp.lt.s32.totalorder %s194_s18, %s194_s18 }
   0xc   :  { %p201_p6 = por %p200_p5, %p199_p4 }
   0xe   :  { %p202_p7 = pnand %p201_p6, %p195_p3 }
  0x10   :  { %205 = shalt.err (!%p202_p7)
}
  0x11   :  { %s257_s19 = smov 512   ;;  %s258_s20 = smov 32  }
  0x12   :  { %21 = dma.hbm_to_vmem [thread:$0]  %s321_s0, 1024, %s16_s10, [#allocation3], %s257_s19, %s257_s19, %s258_s20  }
  0x13   :  { %s259_s23 = smov [#allocation5]   ;;  %s206_s27 = scalar_lea.hbm %s322_s1, 1024 }
  0x14   :  { %s27_s24 = sshll.u32 %s259_s23, 4  ;;  %p207_p8 = scmp.ne.s32.totalorder %s322_s1, %s206_s27  ;;  %s28_s24 = int_to_ptr.vmem [resolvable:$true] %s27_s24 }
  0x15   :  { %p210_p9 = scmp.lt.u32.totalorder %s206_s27, %s322_s1 }
  0x17   :  { %p212_p10 = pnand %p210_p9, %p207_p8 }
  0x19   :  { %215 = shalt.err (!%p212_p10)
}
  0x1a   :  { %s216_s4 = scalar_lea.vmem %s28_s24, 1024  ;;  %p221_p12 = scmp.lt.s32.totalorder %s28_s24, %s28_s24 }
  0x1b   :  { %p217_p11 = scmp.ne.s32.totalorder %s28_s24, %s216_s4  ;;  %p222_p13 = scmp.lt.s32.totalorder %s216_s4, %s216_s4 }
  0x1d   :  { %p223_p0 = por %p222_p13, %p221_p12 }
  0x1f   :  { %p224_p1 = pnand %p223_p0, %p217_p11 }
  0x21   :  { %227 = shalt.err (!%p224_p1)
}
  0x22   :  { %33 = dma.hbm_to_vmem [thread:$0]  %s322_s1, 1024, %s28_s24, [#allocation6], %s257_s19, %s257_s19, %s258_s20  }
  0x23   :  { %250 = dma.done.wait [#allocation3], 1024  }
  0x24   :  { %251 = vsyncadd [#allocation3], 4294966272 }
  0x25   :  { %252 = dma.done.wait [#allocation6], 1024  }
  0x26   :  { %253 = vsyncadd [#allocation6], 4294966272  ;;  %v56_v0 = vld [vmem:[#allocation5] sm:$0xff]  ;;  %v57_v2 = vld [vmem:[#allocation5 + $0x8] sm:$0xff]  ;;  %s260_s1 = smov [#allocation7]  }
  0x27   :  { %v64_v1 = vadd.f32 0.5, %v56_v0  ;;  %v58_v3 = vld [vmem:[#allocation5 + $0x10] sm:$0xff]  ;;  %v65_v4 = vadd.f32 0.5, %v57_v2  ;;  %v59_v6 = vld [vmem:[#allocation5 + $0x18] sm:$0xff]  ;;  %v60_v8 = vld [vmem:[#allocation5 + $0x20] sm:$0xff]  ;;  %s134_s6 = sshll.u32 %s260_s1, 4  ;;  %s135_s6 = int_to_ptr.vmem [resolvable:$true] %s134_s6 }
  0x28   :  { %v66_v5 = vadd.f32 0.5, %v58_v3  ;;  %v67_v7 = vadd.f32 0.5, %v59_v6  ;;  %v61_v9 = vld [vmem:[#allocation5 + $0x28] sm:$0xff]  ;;  %v68_v10 = vadd.f32 0.5, %v60_v8  ;;  %v62_v12 = vld [vmem:[#allocation5 + $0x30] sm:$0xff]  ;;  %v63_v14 = vld [vmem:[#allocation5 + $0x38] sm:$0xff]  ;;  %p233_p3 = scmp.lt.s32.totalorder %s135_s6, %s135_s6 }
  0x29   :  { %152 = vrcp.f32 %v64_v1  ;;  %v69_v11 = vadd.f32 0.5, %v61_v9  ;;  %v70_v13 = vadd.f32 0.5, %v62_v12  ;;  %v71_v15 = vadd.f32 0.5, %v63_v14  ;;  %v40_v16 = vld [vmem:[#allocation2] sm:$0xff]  ;;  %v41_v17 = vld [vmem:[#allocation2 + $0x8] sm:$0xff]  ;;  %v42_v18 = vld [vmem:[#allocation2 + $0x10] sm:$0xff] }
  0x2a   :  { %154 = vrcp.f32 %v65_v4  ;;  %v48_v19 = vadd.f32 0.5, %v40_v16  ;;  %v43_v20 = vld [vmem:[#allocation2 + $0x18] sm:$0xff]  ;;  %v49_v21 = vadd.f32 0.5, %v41_v17  ;;  %v44_v22 = vld [vmem:[#allocation2 + $0x20] sm:$0xff]  ;;  %v50_v23 = vadd.f32 0.5, %v42_v18  ;;  %v45_v24 = vld [vmem:[#allocation2 + $0x28] sm:$0xff] }
  0x2b   :  { %156 = vrcp.f32 %v66_v5  ;;  %v51_v26 = vadd.f32 0.5, %v43_v20  ;;  %v46_v27 = vld [vmem:[#allocation2 + $0x30] sm:$0xff]  ;;  %v52_v30 = vadd.f32 0.5, %v44_v22  ;;  %v47_v31 = vld [vmem:[#allocation2 + $0x38] sm:$0xff]  ;;  %v53_v34 = vadd.f32 0.5, %v45_v24  ;;  %s228_s7 = scalar_lea.vmem %s135_s6, 1024 }
  0x2c   :  { %158 = vrcp.f32 %v67_v7  ;;  %v54_v37 = vadd.f32 0.5, %v46_v27  ;;  %v55_v40 = vadd.f32 0.5, %v47_v31  ;;  %p229_p2 = scmp.ne.s32.totalorder %s135_s6, %s228_s7  ;;  %p234_p4 = scmp.lt.s32.totalorder %s228_s7, %s228_s7 }
  0x2d   :  { %160 = vrcp.f32 %v68_v10 }
  0x2e   :  { %162 = vrcp.f32 %v69_v11  ;;  %p235_p5 = por %p234_p4, %p233_p3 }
  0x2f   :  { %164 = vrcp.f32 %v70_v13 }
  0x30   :  { %166 = vrcp.f32 %v71_v15  ;;  %p236_p6 = pnand %p235_p5, %p229_p2 }
  0x33   :  { %v153_v25 = vpop.eup %152 }
  0x34   :  { %v155_v28 = vpop.eup %154  ;;  %v73_v29 = vmul.f32 %v153_v25, %v48_v19 }
  0x35   :  { %v157_v32 = vpop.eup %156  ;;  %v75_v33 = vmul.f32 %v155_v28, %v49_v21 }
  0x36   :  { %v159_v35 = vpop.eup %158  ;;  %168 = vlog2.f32 %v73_v29  ;;  %v77_v36 = vmul.f32 %v157_v32, %v50_v23 }
  0x37   :  { %v161_v38 = vpop.eup %160  ;;  %170 = vlog2.f32 %v75_v33  ;;  %v79_v39 = vmul.f32 %v159_v35, %v51_v26 }
  0x38   :  { %v163_v41 = vpop.eup %162  ;;  %172 = vlog2.f32 %v77_v36  ;;  %v81_v42 = vmul.f32 %v161_v38, %v52_v30 }
  0x39   :  { %v165_v43 = vpop.eup %164  ;;  %174 = vlog2.f32 %v79_v39  ;;  %v83_v44 = vmul.f32 %v163_v41, %v53_v34 }
  0x3a   :  { %v167_v45 = vpop.eup %166  ;;  %176 = vlog2.f32 %v81_v42  ;;  %v85_v46 = vmul.f32 %v165_v43, %v54_v37 }
  0x3b   :  { %178 = vlog2.f32 %v83_v44  ;;  %v87_v47 = vmul.f32 %v167_v45, %v55_v40 }
  0x3c   :  { %180 = vlog2.f32 %v85_v46 }
  0x3d   :  { %182 = vlog2.f32 %v87_v47 }
  0x40   :  { %v169_v48 = vpop.eup %168 }
  0x41   :  { %v171_v49 = vpop.eup %170  ;;  %v89_v50 = vmul.f32 0.6931472, %v169_v48 }
  0x42   :  { %v173_v51 = vpop.eup %172  ;;  %v91_v52 = vmul.f32 0.6931472, %v171_v49 }
  0x43   :  { %v175_v53 = vpop.eup %174  ;;  %v105_v54 = vmul.f32 1.442695, %v89_v50  ;;  %v93_v55 = vmul.f32 0.6931472, %v173_v51 }
  0x44   :  { %v177_v56 = vpop.eup %176  ;;  %v106_v57 = vmul.f32 1.442695, %v91_v52  ;;  %v95_v58 = vmul.f32 0.6931472, %v175_v53 }
  0x45   :  { %v179_v59 = vpop.eup %178  ;;  %v113_v60 = vand.u32 2147483647, %v105_v54  ;;  %v107_v61 = vmul.f32 1.442695, %v93_v55  ;;  %v97_v62 = vmul.f32 0.6931472, %v177_v56 }
  0x46   :  { %v181_v63 = vpop.eup %180  ;;  %v114_v0 = vand.u32 2147483647, %v106_v57  ;;  %v108_v1 = vmul.f32 1.442695, %v95_v58  ;;  %v99_v2 = vmul.f32 0.6931472, %v179_v59 }
  0x47   :  { %v183_v3 = vpop.eup %182  ;;  %121 = vst [vmem:[#allocation7] sm:$0xff] %v113_v60  ;;  %v115_v4 = vand.u32 2147483647, %v107_v61  ;;  %v109_v5 = vmul.f32 1.442695, %v97_v62 }
  0x48   :  { %v101_v6 = vmul.f32 0.6931472, %v181_v63  ;;  %122 = vst [vmem:[#allocation7 + $0x8] sm:$0xff] %v114_v0  ;;  %v116_v7 = vand.u32 2147483647, %v108_v1 }
  0x49   :  { %v110_v8 = vmul.f32 1.442695, %v99_v2  ;;  %v103_v9 = vmul.f32 0.6931472, %v183_v3  ;;  %123 = vst [vmem:[#allocation7 + $0x10] sm:$0xff] %v115_v4 }
  0x4a   :  { %v117_v10 = vand.u32 2147483647, %v109_v5  ;;  %v111_v11 = vmul.f32 1.442695, %v101_v6  ;;  %124 = vst [vmem:[#allocation7 + $0x18] sm:$0xff] %v116_v7 }
  0x4b   :  { %v118_v12 = vand.u32 2147483647, %v110_v8  ;;  %v112_v13 = vmul.f32 1.442695, %v103_v9 }
  0x4c   :  { %125 = vst [vmem:[#allocation7 + $0x20] sm:$0xff] %v117_v10  ;;  %v119_v14 = vand.u32 2147483647, %v111_v11 }
  0x4d   :  { %126 = vst [vmem:[#allocation7 + $0x28] sm:$0xff] %v118_v12  ;;  %v120_v15 = vand.u32 2147483647, %v112_v13 }
  0x4e   :  { %127 = vst [vmem:[#allocation7 + $0x30] sm:$0xff] %v119_v14 }
  0x4f   :  { %128 = vst [vmem:[#allocation7 + $0x38] sm:$0xff] %v120_v15 }
  0x50   :  { %239 = shalt.err (!%p236_p6)
}
  0x51   :  { %s240_s10 = scalar_lea.hbm %s323_s2, 1024 }
  0x52   :  { %p241_p7 = scmp.ne.s32.totalorder %s323_s2, %s240_s10  ;;  %p244_p8 = scmp.lt.u32.totalorder %s240_s10, %s323_s2 }
  0x54   :  { %p246_p9 = pnand %p244_p8, %p241_p7 }
  0x56   :  { %249 = shalt.err (!%p246_p9)
}
  0x57   :  { %140 = dma.vmem_to_hbm [thread:$0]  %s135_s6, 1024, %s323_s2, [#allocation4], %s257_s19, %s257_s19, %s258_s20  }
  0x58   :  { %254 = dma.done.wait [#allocation4], 1024  }
  0x59   :  { %255 = vsyncadd [#allocation4], 4294966272 }
  0x5a   :  { %144 = vsyncpa [#allocation3], 1 }
  0x5b   :  { %145 = vsyncpa [#allocation6], 1 }
  0x5c   :  { %146 = vsyncpa [#allocation4], 1 }

</bundles_post_ra>
